<compile_context>
chip_gen: v6e
topology: v6e:2x2x1
jax: 0.10.0
libtpu: 0.0.40
codegen_flags: <defaults>
</compile_context>

<pallas_src>
import math

import jax
import jax.numpy as jnp
from jax.experimental import pallas as pl
from jax.experimental.pallas import tpu as pltpu


# ----------------------------------------------------------------------------
# Helpers
# ----------------------------------------------------------------------------
def _round_up(x, m):
    return ((x + m - 1) // m) * m


def _choose_dim_tile(dim_pad, target=512):
    """Largest multiple of 128 that divides dim_pad and is <= target."""
    m = dim_pad // 128
    best = 1
    for d in range(1, m + 1):
        if m % d == 0 and 128 * d <= target:
            best = d
    return 128 * best


# ----------------------------------------------------------------------------
# Pallas kernel: fused matmul + bias for the modulation Linear layer,
# output laid out as (6, B_pad, dim_pad).
# ----------------------------------------------------------------------------
def _dit_modulation_kernel(cond_ref, w_ref, b_ref, out_ref):
    # cond_ref : (B_pad, cond_dim)        VMEM (bf16) -- reused by every tile
    # w_ref    : (1, cond_dim, TD)        VMEM (bf16) -- streamed weight tile
    # b_ref    : (1, 1, TD)               VMEM (f32)
    # out_ref  : (1, B_pad, TD)           VMEM (out dtype)
    acc = jnp.dot(cond_ref[...], w_ref[0],
                  preferred_element_type=jnp.float32)
    out_ref[0] = (acc + b_ref[0]).astype(out_ref.dtype)


def dit_modulation(cond_p, weight, bias, *, out_dtype, dim_tile):
    """cond_p @ weight + bias, tiled over the (chunk, dim) output axes.

    cond_p : (B_pad, cond_dim)        already padded / cast to matmul dtype
    weight : (6, cond_dim, dim_pad)   bf16, lane-dense on the last axis
    bias   : (6, 1, dim_pad)          f32
    returns: (6, B_pad, dim_pad)      out_dtype
    """
    B_pad, cond_dim = cond_p.shape
    six, _, dim_pad = weight.shape
    assert dim_pad % dim_tile == 0
    n_tiles = dim_pad // dim_tile

    flops = 2 * B_pad * cond_dim * six * dim_pad
    bytes_accessed = (
        cond_p.size * cond_p.dtype.itemsize
        + weight.size * weight.dtype.itemsize
        + bias.size * bias.dtype.itemsize
        + six * B_pad * dim_pad * jnp.dtype(out_dtype).itemsize
    )

    return pl.pallas_call(
        _dit_modulation_kernel,
        out_shape=jax.ShapeDtypeStruct((six, B_pad, dim_pad), out_dtype),
        grid=(six, n_tiles),
        in_specs=[
            pl.BlockSpec((B_pad, cond_dim), lambda c, j: (0, 0)),
            pl.BlockSpec((1, cond_dim, dim_tile), lambda c, j: (c, 0, j)),
            pl.BlockSpec((1, 1, dim_tile), lambda c, j: (c, 0, j)),
        ],
        out_specs=pl.BlockSpec((1, B_pad, dim_tile), lambda c, j: (c, 0, j)),
        compiler_params=pltpu.CompilerParams(
            dimension_semantics=("parallel", "parallel"),
            vmem_limit_bytes=32 * 1024 * 1024,
        ),
        cost_estimate=pl.CostEstimate(
            flops=flops, transcendentals=0, bytes_accessed=int(bytes_accessed)
        ),
    )(cond_p, weight, bias)


# ----------------------------------------------------------------------------
# DiT module in JAX (parameters created deterministically in-script).
# ----------------------------------------------------------------------------
class DiT:
    def __init__(self, dim, cond_dim, key, gate_indices=None,
                 init_weights="xavier_uniform", init_gate_zero=False,
                 param_dtype=jnp.bfloat16, dim_tile_target=512):
        self.dim = dim
        self.cond_dim = cond_dim
        self.param_dtype = param_dtype

        k_w, k_b = jax.random.split(key)
        out_features = 6 * dim
        in_features = cond_dim

        if init_weights == "xavier_uniform":
            limit = math.sqrt(6.0 / (in_features + out_features))
            weight = jax.random.uniform(
                k_w, (out_features, in_features), jnp.float32, -limit, limit
            )
        elif init_weights == "torch":
            # nn.Linear default (kaiming_uniform a=sqrt(5)) -> U(+-1/sqrt(fan_in))
            limit = 1.0 / math.sqrt(in_features)
            weight = jax.random.uniform(
                k_w, (out_features, in_features), jnp.float32, -limit, limit
            )
        else:
            # TODO(synk): truncnormal / truncnormal002 inits not reproduced.
            raise NotImplementedError(init_weights)

        # nn.Linear default bias init: U(-1/sqrt(fan_in), 1/sqrt(fan_in))
        b_bound = 1.0 / math.sqrt(in_features)
        bias = jax.random.uniform(
            k_b, (out_features,), jnp.float32, -b_bound, b_bound
        )

        if init_gate_zero:
            assert gate_indices is not None
            for gate_index in gate_indices:
                start = dim * gate_index
                end = dim * (gate_index + 1)
                weight = weight.at[start:end].set(0.0)
                bias = bias.at[start:end].set(0.0)

        # Keep f32 originals around for reference checks.
        self.weight_f32 = weight            # (6*dim, cond_dim)
        self.bias_f32 = bias                # (6*dim,)

        # Kernel layout: weight (6, cond_dim, dim_pad) bf16, bias (6,1,dim_pad) f32.
        self.dim_pad = _round_up(dim, 128)
        self.dim_tile = _choose_dim_tile(self.dim_pad, dim_tile_target)

        w3 = weight.reshape(6, dim, cond_dim)
        w3 = jnp.pad(w3, ((0, 0), (0, self.dim_pad - dim), (0, 0)))
        self.w_kernel = jnp.transpose(w3, (0, 2, 1)).astype(param_dtype)

        b3 = bias.reshape(6, 1, dim)
        self.b_kernel = jnp.pad(
            b3, ((0, 0), (0, 0), (0, self.dim_pad - dim))
        ).astype(jnp.float32)

    def __call__(self, cond):
        # cond: (B, cond_dim)  ->  tuple of 6 arrays, each (B, dim)
        B, cond_dim = cond.shape
        assert cond_dim == self.cond_dim
        out_dtype = cond.dtype

        B_pad = _round_up(B, 8)
        cond_p = cond.astype(self.param_dtype)
        if B_pad != B:
            cond_p = jnp.pad(cond_p, ((0, B_pad - B), (0, 0)))

        out = dit_modulation(
            cond_p, self.w_kernel, self.b_kernel,
            out_dtype=out_dtype, dim_tile=self.dim_tile,
        )  # (6, B_pad, dim_pad)

        if B_pad == B and self.dim_pad == self.dim:
            return tuple(out[i] for i in range(6))
        return tuple(out[i, :B, :self.dim] for i in range(6))

    # Static helpers (broadcast glue, kept in plain JAX).
    # TODO(synk): for real DiT workloads, fuse these into the x-streaming
    # Pallas kernel of the consuming block (x is the HBM-dominant tensor).
    @staticmethod
    def modulate_scale_shift(x, scale, shift):
        extra = x.ndim - scale.ndim
        scale = scale.reshape(scale.shape[0], *(1,) * extra, *scale.shape[1:])
        shift = shift.reshape(shift.shape[0], *(1,) * extra, *shift.shape[1:])
        return x * (1 + scale) + shift

    @staticmethod
    def modulate_gate(x, gate):
        extra = x.ndim - gate.ndim
        gate = gate.reshape(gate.shape[0], *(1,) * extra, *gate.shape[1:])
        return gate * x


if __name__ == "__main__":
    key = jax.random.PRNGKey(0)
    k_params, k_cond = jax.random.split(key)

    batch = 2
    dim = 32
    cond_dim = 16

    model = DiT(dim=dim, cond_dim=cond_dim, key=k_params)

    cond = jax.random.normal(k_cond, (batch, cond_dim), jnp.float32)

    chunks = model(cond)
    chunks = jax.block_until_ready(chunks)

    # Correctness check against a plain-JAX reference of the same math path
    # (bf16 operands, f32 accumulation, f32 bias add).
    w_bf16_t = model.weight_f32.T.astype(jnp.bfloat16)        # (cond_dim, 6*dim)
    ref_full = jnp.dot(cond.astype(jnp.bfloat16), w_bf16_t,
                       preferred_element_type=jnp.float32) + model.bias_f32
    ref_chunks = jnp.split(ref_full, 6, axis=1)

    assert len(chunks) == 6
    for got, ref in zip(chunks, ref_chunks):
        assert got.shape == (batch, dim)
        assert jnp.allclose(got, ref, atol=1e-3, rtol=1e-3)

    # Sanity-check the static modulate helpers (glue, not kernelized).
    x = jax.random.normal(jax.random.PRNGKey(1), (batch, 8, dim), jnp.float32)
    shift, scale, gate = chunks[0], chunks[1], chunks[2]
    y = DiT.modulate_scale_shift(x, scale, shift)
    y = DiT.modulate_gate(y, gate)
    jax.block_until_ready(y)

    print("KERNEL_OK")
</pallas_src>

<mosaic_0001>
module attributes {stable_mosaic.version = 11 : i64} {
  func.func @_dit_modulation_kernel(%arg0: i32, %arg1: i32, %arg2: memref<8x16xbf16, #tpu.memory_space<vmem>>, %arg3: memref<1x16x128xbf16, #tpu.memory_space<vmem>>, %arg4: memref<1x1x128xf32, #tpu.memory_space<vmem>>, %arg5: memref<1x8x128xf32, #tpu.memory_space<vmem>>) attributes {dimension_semantics = [#tpu.dimension_semantics<parallel>, #tpu.dimension_semantics<parallel>], iteration_bounds = array<i64: 6, 1>, scalar_prefetch = 0 : i64, scratch_operands = 0 : i64, tpu.core_type = #tpu.core_type<tc>, window_params = [{pipeline_mode = #tpu.pipeline_mode<synchronous>, transform_indices = @transform_0, window_bounds = array<i64: 8, 16>}, {transform_indices = @transform_1, window_bounds = array<i64: 1, 16, 128>}, {transform_indices = @transform_2, window_bounds = array<i64: 1, 1, 128>}, {transform_indices = @transform_3, window_bounds = array<i64: 1, 8, 128>}]} {
    %c0 = arith.constant 0 : index
    %c0_0 = arith.constant 0 : index
    %0 = vector.load %arg2[%c0, %c0_0] : memref<8x16xbf16, #tpu.memory_space<vmem>>, vector<8x16xbf16>
    %c0_1 = arith.constant 0 : index
    %c0_2 = arith.constant 0 : index
    %c0_3 = arith.constant 0 : index
    %1 = vector.load %arg3[%c0_1, %c0_2, %c0_3] : memref<1x16x128xbf16, #tpu.memory_space<vmem>>, vector<1x16x128xbf16>
    %2 = vector.shape_cast %1 : vector<1x16x128xbf16> to vector<16x128xbf16>
    %cst = arith.constant dense<0.000000e+00> : vector<8x128xf32>
    %3 = tpu.matmul %0, %2, %cst {dimension_numbers = #tpu.dot_dimension_numbers<[1], [0], [0], [1], [0, 0, 1, 1], [], []>} : vector<8x16xbf16>, vector<16x128xbf16>, vector<8x128xf32> -> vector<8x128xf32>
    %c0_4 = arith.constant 0 : index
    %c0_5 = arith.constant 0 : index
    %c0_6 = arith.constant 0 : index
    %4 = vector.load %arg4[%c0_4, %c0_5, %c0_6] : memref<1x1x128xf32, #tpu.memory_space<vmem>>, vector<1x1x128xf32>
    %5 = vector.shape_cast %4 : vector<1x1x128xf32> to vector<1x128xf32>
    %6 = vector.broadcast %5 : vector<1x128xf32> to vector<8x128xf32>
    %7 = arith.addf %3, %6 : vector<8x128xf32>
    %c0_7 = arith.constant 0 : index
    %c0_8 = arith.constant 0 : index
    %c0_9 = arith.constant 0 : index
    %8 = vector.load %arg5[%c0_7, %c0_8, %c0_9] : memref<1x8x128xf32, #tpu.memory_space<vmem>>, vector<1x8x128xf32>
    %9 = vector.shape_cast %8 : vector<1x8x128xf32> to vector<8x128xf32>
    %10 = vector.shape_cast %7 : vector<8x128xf32> to vector<1x8x128xf32>
    tpu.vector_store %arg5[%c0_7, %c0_8, %c0_9], %10 {strides = array<i32>} : memref<1x8x128xf32, #tpu.memory_space<vmem>>, vector<1x8x128xf32>,
    return
  }
  func.func @transform_0(%arg0: i32, %arg1: i32) -> (i32, i32) {
    %c0_i32 = arith.constant 0 : i32
    %c0_i32_0 = arith.constant 0 : i32
    %c0_i32_1 = arith.constant 0 : i32
    return %c0_i32, %c0_i32_0 : i32, i32
  }
  func.func @transform_1(%arg0: i32, %arg1: i32) -> (i32, i32, i32) {
    %c0_i32 = arith.constant 0 : i32
    %c0_i32_0 = arith.constant 0 : i32
    return %arg0, %c0_i32, %arg1 : i32, i32, i32
  }
  func.func @transform_2(%arg0: i32, %arg1: i32) -> (i32, i32, i32) {
    %c0_i32 = arith.constant 0 : i32
    %c0_i32_0 = arith.constant 0 : i32
    return %arg0, %c0_i32, %arg1 : i32, i32, i32
  }
  func.func @transform_3(%arg0: i32, %arg1: i32) -> (i32, i32, i32) {
    %c0_i32 = arith.constant 0 : i32
    %c0_i32_0 = arith.constant 0 : i32
    return %arg0, %c0_i32, %arg1 : i32, i32, i32
  }
}

</mosaic_0001>

<bundles_post_ra>
// kernel: tpu_custom_call.1
= control target key start
LH: loop header
LB: loop body
LE: loop exit
PB: predicated region body
PF: predicated region fallthrough
CT: control target
= control target key end

     0   :  { %8 = vsyncpa [#allocation3], 0  ;;  %s949_s0 = inlined_call_operand.hbm [shape: bf16[8,16], index: 0, kind: input, shape index: {}]   ;;  %s950_s1 = inlined_call_operand.hbm [shape: bf16[6,16,128], index: 1, kind: input, shape index: {}]   ;;  %s951_s2 = inlined_call_operand.hbm [shape: f32[6,1,128], index: 2, kind: input, shape index: {}]   ;;  %s952_s3 = inlined_call_operand.hbm [shape: f32[6,8,128], index: 3, kind: output, shape index: {}]  }
   0x1   :  { %9 = vsyncpa [#allocation6], 0 }
   0x2   :  { %11 = vsyncpa [#allocation6 + $0x1], 0 }
   0x3   :  { %12 = vsyncpa [#allocation4], 0 }
   0x4   :  { %14 = vsyncpa [#allocation4 + $0x1], 0  ;;  %s749_s12 = smov 0   ;;  %s751_s13 = smov 0  }
   0x5   :  { %s753_s14 = smov 0   ;;  %s755_s15 = smov 0  }
   0x6   :  { %s757_s16 = smov 0   ;;  %s759_s17 = smov 0  }
   0x7 LB: > { %s32_s18 = sadd.s32 1, %s715_s16  ;;  %s62_s19 = sadd.s32 1, %s707_s14  ;;  %s719_s17 = sphi %s759_s17, %s20_s17   ;;  %s715_s16 = sphi %s757_s16, %s971_s16   ;;  %s711_s15 = sphi %s755_s15, %s970_s15   ;;  %s707_s14 = sphi %s753_s14, %s969_s14   ;;  %s703_s13 = sphi %s751_s13, %s968_s13   ;;  %s699_s12 = sphi %s749_s12, %s967_s12  }
   0x8   : > { %p34_p0 = scmp.ge.s32.totalorder %s32_s18, 6  ;;  %p69_p1 = scmp.ne.s32.totalorder %s707_s14, %s703_s13 }
   0x9   : > { %p70_p2 = scmp.eq.s32.totalorder %s719_s17, 0  ;;  %p496_p4 = scmp.lt.s32.totalorder %s719_s17, 6 }
   0xa   : > { %s973_s18 = smov (%p34_p0, %s32_s18), 0  ;;  %s166_s21 = sand.u32 1, %s719_s17  }
   0xb   : > { %p71_p3 = por %p70_p2, %p69_p1  ;;  %s57_s20 = ssub.s32 %s715_s16, %s973_s18 }
   0xc   : > { %p60_p5 = scmp.eq.s32.totalorder %s57_s20, 0  ;;  %s168_s22 = sand.u32 1, %s707_s14  }
   0xd   : > { %s461_s23 = sshll.u32 %s715_s16, 7  ;;  %s446_s25 = sshll.u32 %s168_s22, 3 }
   0xe   : > { %s796_s24 = scalar_select %p60_p5, %s707_s14, %s62_s19  }
   0xf   : > { %s177_s28 = scalar_lea.hbm %s950_s1, %s461_s23  ;;  %p803_p6 = pnand %p496_p4, %p71_p3 }
  0x10   : > { %s170_s30 = scalar_lea.vmem [#allocation5], %s446_s25  ;;  %s807_s5 = scalar_lea.sflag [#allocation6], %s166_s21 }
  0x11   : > { %s178_s4 = sshll.u32 %s170_s30, 4  ;;  %p555_p7 = pneg %p803_p6  ;;  %s179_s4 = int_to_ptr.vmem [resolvable:$true] %s178_s4 }
  0x12   : > { %s566_s6 = scalar_lea.vmem %s179_s4, 128  ;;  %s721_s7 = smov [#allocation5]  }
  0x13   : > { %p567_p8 = scmp.ne.s32.totalorder %s179_s4, %s566_s6  ;;  %s571_s8 = sshll.u32 %s721_s7, 4  ;;  %s572_s8 = int_to_ptr.vmem [resolvable:$false] %s571_s8 }
  0x14   : > { %s573_s9 = scalar_lea.vmem %s572_s8, 256  ;;  %p574_p11 = scmp.lt.s32.totalorder %s179_s4, %s572_s8 }
  0x15   : > { %p569_p9 = pnand %p567_p8, %p555_p7  ;;  %p575_p12 = scmp.lt.s32.totalorder %s573_s9, %s566_s6 }
  0x17   : > { %p570_p10 = pneg %p569_p9  ;;  %p576_p13 = por %p575_p12, %p574_p11 }
  0x19   : > { %p577_p0 = pnand %p576_p13, %p570_p10 }
  0x1b   : > { %580 = shalt.err (!%p577_p0)
}
  0x1c   : > { %s722_s10 = smov 64   ;;  %s723_s11 = smov 4  }
  0x1d   : > { %487 = dma.hbm_to_vmem [thread:$0]  (!%p803_p6), %s177_s28, 128, %s179_s4, %s807_s5, %s722_s10, %s722_s10, %s723_s11  }
  0x1e   : > { %s818_s19 = sadd.s32 4294967295, %s719_s17   ;;  %s442_s20 = sadd.s32 4294967294, %s719_s17  }
  0x1f   : > { %p75_p2 = scmp.ne.s32.totalorder %s703_s13, %s699_s12  ;;  %p954_p3 = scmp.eq.s32.totalorder %s818_s19, 0 }
  0x20   : > { %p129_p4 = scmp.eq.s32.totalorder %s818_s19, 5  ;;  %p135_p5 = scmp.eq.s32.totalorder %s442_s20, 5 }
  0x21   : > { %p443_p8 = scmp.ge.s32.totalorder %s719_s17, 1  ;;  %p828_p9 = por %p954_p3, %p75_p2 }
  0x22   : > { %p835_p10 = por %p129_p4, %p69_p1  ;;  %p839_p11 = por %p135_p5, %p75_p2 }
  0x23   : > { %s957_s21 = scalar_select %p828_p9, 1, 0 }
  0x24   : > { %s958_s23 = scalar_select %p835_p10, 1, 0 }
  0x25   : > { %s959_s25 = scalar_select %p839_p11, 1, 0 }
  0x26   : > { %p142_p12 = scmp.lt.s32.totalorder %s719_s17, 7  ;;  %s724_s27 = smov [#allocation2]  }
  0x27   : > { %s155_s28 = sshll.u32 %s724_s27, 4  ;;  %s449_s30 = sshll.u32 %s715_s16, 4  ;;  %s848_s28 = int_to_ptr.vmem [resolvable:$true] %s155_s28 }
  0x28   : > { %p844_p13 = pnand %p443_p8, %p142_p12  ;;  %s197_s7 = scalar_lea.hbm %s951_s2, %s449_s30 }
  0x29   : > { %s191_s8 = scalar_lea.vmem [#allocation7], %s168_s22  ;;  %s725_s20 = smov [#allocation7]  }
  0x2a   : > { %p480_p1 = pneg %p844_p13  ;;  %s199_s9 = sshll.u32 %s191_s8, 4  ;;  %s200_s9 = int_to_ptr.vmem [resolvable:$true] %s199_s9 }
  0x2b   : > { %s594_s11 = scalar_lea.vmem %s200_s9, 16  ;;  %s599_s27 = sshll.u32 %s725_s20, 4  ;;  %s600_s27 = int_to_ptr.vmem [resolvable:$false] %s599_s27 }
  0x2c   : > { %p860_p0 = pnand %p480_p1, %p954_p3  ;;  %p595_p2 = scmp.ne.s32.totalorder %s200_s9, %s594_s11 }
  0x2d   : > { %s601_s4 = scalar_lea.vmem %s600_s27, 32  ;;  %p602_p8 = scmp.lt.s32.totalorder %s200_s9, %s600_s27 }
  0x2e   : > { %p597_p4 = pnand %p595_p2, %p555_p7  ;;  %p603_p12 = scmp.lt.s32.totalorder %s601_s4, %s594_s11 }
  0x30   : > { %p598_p5 = pneg %p597_p4  ;;  %p604_p11 = por %p603_p12, %p602_p8 }
  0x32   : > { %p605_p10 = pnand %p604_p11, %p598_p5 }
  0x34   : > { %608 = shalt.err (!%p605_p10)
}
  0x35   : > { %490 = dma.hbm_to_vmem [thread:$0]  (!%p803_p6), %s197_s7, 16, %s200_s9, %s807_s5  }
  0x36   : > { %p611_p7 = pneg %p860_p0  ;;  %s620_s22 = scalar_lea.vmem %s848_s28, 64 }
  0x37   : > { %p621_p1 = scmp.ne.s32.totalorder %s848_s28, %s620_s22  ;;  %p628_p3 = scmp.lt.s32.totalorder %s848_s28, %s848_s28 }
  0x38   : > { %p629_p9 = scmp.lt.s32.totalorder %s620_s22, %s620_s22 }
  0x39   : > { %p623_p2 = pnand %p621_p1, %p611_p7 }
  0x3a   : > { %p630_p8 = por %p629_p9, %p628_p3 }
  0x3b   : > { %p624_p4 = pneg %p623_p2 }
  0x3d   : > { %p631_p11 = pnand %p630_p8, %p624_p4 }
  0x3f   : > { %634 = shalt.err (!%p631_p11)
}
  0x40   : > { %483 = dma.hbm_to_vmem [thread:$0]  (!%p860_p0), %s949_s0, 64, %s848_s28, [#allocation3]  }
  0x41   : > { %208 = sbr.rel (%p844_p13) target bundleno = 290 (0x122), region = 32  ;;  %p962_p6 = scmp.eq.s32.totalorder (!%p844_p13), %s818_s19, 0 }
  0x46   : > { %686 = dma.done.wait (%p962_p6), [#allocation3], 64   ;;  %p963_p10 = pmov %p962_p6 }
  0x47   : > { %s214_s5 = sand.u32 1, %s818_s19   ;;  %s890_s6 = sand.u32 1, %s703_s13  }
  0x48   : > { %688 = vsyncadd (%p963_p10), [#allocation3], 4294967232  ;;  %s452_s7 = sshll.u32 %s890_s6, 3  ;;  %s215_s8 = scalar_lea.sflag [#allocation6], %s214_s5 }
  0x49   : > { %s218_s9 = scalar_lea.vmem [#allocation5], %s452_s7  ;;  %p964_p3 = scmp.ne.s32.totalorder %s957_s21, 0 }
  0x4b   : > { %690 = dma.done.wait (%p964_p3), %s215_s8, 144  }
  0x4c   : > { %692 = vsyncadd (%p964_p3), %s215_s8, 4294967152  ;;  %v726_v0 = vmov 0.0   ;;  %vm727_vm0 = vmmov 0   ;;  %v552_v1 = vld [vmem:[%s218_s9] sm:$0xff]   ;;  %v254_v2 = vld [vmem:[#allocation2] sm:$0xf] }
  0x4d   : > { %464 = vmatprep.subr.bf16.mxu0 %v726_v0  ;;  %466 = vmatprep.mubr.msk.bf16.mxu0 %vm727_vm0, %v726_v0  ;;  %vm270_vm1 = vcmask 130048   ;;  %s226_s19 = scalar_lea.vmem [#allocation7], %s890_s6  ;;  %s458_s26 = sshll.u32 %s711_s15, 7 }
  0x4e   : > { %465 = vmatpush3.bf16.msra.mxu0 %v552_v1  ;;  %v454_v3 = vld [vmem:[%s226_s19] ss:$0 sm:$0xff]  ;;  %s252_s28 = scalar_lea.vmem [#allocation8], %s452_s7  ;;  %s902_s20 = scalar_lea.hbm %s952_s3, %s458_s26 }
  0x4f   : > { %s330_s10 = sshll.u32 %s252_s28, 4  ;;  %s316_s27 = scalar_lea.sflag [#allocation4], %s890_s6  ;;  %s904_s10 = int_to_ptr.vmem [resolvable:$true] %s330_s10 }
  0x50   : > { %s635_s4 = scalar_lea.vmem %s904_s10, 128  ;;  %p965_p13 = scmp.ne.s32.totalorder %s958_s23, 0 }
  0x51   : > { %467 = vmatmul.mubr.msk.bf16.vlgmr.msra.gmra.mxu0 %vm270_vm1, %v254_v2  ;;  %p636_p9 = scmp.ne.s32.totalorder %s904_s10, %s635_s4  ;;  %s728_s15 = smov [#allocation8]  }
  0x52   : > { %s639_s22 = sshll.u32 %s728_s15, 4  ;;  %s640_s22 = int_to_ptr.vmem [resolvable:$false] %s639_s22 }
  0x53   : > { %p637_p0 = pnand %p636_p9, %p965_p13  ;;  %s641_s29 = scalar_lea.vmem %s640_s22, 256 }
  0x54   : > { %p642_p12 = scmp.lt.s32.totalorder %s904_s10, %s640_s22  ;;  %p643_p7 = scmp.lt.s32.totalorder %s641_s29, %s635_s4 }
  0x55   : > { %p638_p5 = pneg %p637_p0 }
  0x56   : > { %p644_p1 = por %p643_p7, %p642_p12 }
  0x58   : > { %p645_p2 = pnand %p644_p1, %p638_p5 }
 0x111   : > { %v308_v4 = vpop.f32.mrf.mxu0 }
 0x112   : > { %v309_v5 = vadd.f32 %v454_v3, %v308_v4 }
 0x113   : > { %v468_v6 = vpop.f32.mrf.mxu0 }
 0x114   : > { %314 = vst [vmem:[%s252_s28] sm:$0xff] %v309_v5 }
 0x115   : > { %v311_v7 = vpop.f32.mrf.mxu0 }
 0x116   : > { %648 = shalt.err (!%p645_p2)
}
 0x117   : > { %s649_s30 = scalar_lea.hbm %s902_s20, 128  ;;  %s653_s7 = scalar_lea.hbm %s952_s3, 768 }
 0x118   : > { %p650_p4 = scmp.ne.s32.totalorder %s902_s20, %s649_s30  ;;  %p654_p6 = scmp.lt.s32.totalorder %s902_s20, %s952_s3 }
 0x119   : > { %p655_p10 = scmp.lt.s32.totalorder %s653_s7, %s649_s30 }
 0x11a   : > { %p651_p8 = pnand %p650_p4, %p965_p13 }
 0x11b   : > { %p656_p3 = por %p655_p10, %p654_p6 }
 0x11c   : > { %p652_p11 = pneg %p651_p8 }
 0x11e   : > { %p657_p9 = pnand %p656_p3, %p652_p11 }
 0x120   : > { %660 = shalt.err (!%p657_p9)
}
 0x121   : > { %478 = dma.vmem_to_hbm [thread:$0]  (%p965_p13), %s904_s10, 128, %s902_s20, %s316_s27   ;;  %v469_v8 = vpop.f32.mrf.mxu0 }
 0x122 PF: > { %p498_p0 = scmp.ge.s32.totalorder %s719_s17, 2  ;;  %s342_s19 = sand.u32 1, %s699_s12  }
 0x123   : > { %p966_p5 = scmp.ne.s32.totalorder %s959_s25, 0  ;;  %s343_s26 = scalar_lea.sflag [#allocation4], %s342_s19 }
 0x125   : > { %p492_p12 = pnand %p498_p0, %p966_p5 }
 0x127   : > { %p493_p7 = pneg %p492_p12 }
 0x129   : > { %694 = dma.done.wait (%p493_p7), %s343_s26, 128  }
 0x12a   : > { %696 = vsyncadd (%p493_p7), %s343_s26, 4294967168  ;;  %s20_s17 = sadd.s32 1, %s719_s17   ;;  %s967_s12 = smov %s703_s13 }
 0x12b   : > { %p17_p1 = scmp.ge.s32.totalorder %s20_s17, 8   ;;  %s968_s13 = smov %s707_s14 }
 0x12c   : > { %s969_s14 = smov %s796_s24  ;;  %s970_s15 = smov %s715_s16 }
 0x12d   : > { %s971_s16 = smov %s973_s18  ;;  %19 = sbr.rel (!%p17_p1) target bundleno = 7 (0x7), region = 93 }
 0x132   :  { %348 = vsyncpa [#allocation3], 1 }
 0x133   :  { %350 = vsyncpa [#allocation3 + $0x1], 1 }
 0x134   :  { %351 = vsyncpa [#allocation6], 1 }
 0x135   :  { %353 = vsyncpa [#allocation6 + $0x1], 1 }
 0x136   :  { %354 = vsyncpa [#allocation4], 1 }
 0x137   :  { %356 = vsyncpa [#allocation4 + $0x1], 1 }

</bundles_post_ra>
